<compile_context>
chip_gen: v7x
topology: tpu7x:2x2x1
jax: 0.10.0
libtpu: 0.0.40
codegen_flags: <defaults>
</compile_context>

<pallas_src>
import jax
import jax.numpy as jnp
from jax.experimental import pallas as pl
from jax.experimental.pallas import tpu as pltpu

HIDDEN = 32
NODE_IN = 4
FOLD = 128 // HIDDEN            # batch instances folded into the lane axis
LANES = FOLD * HIDDEN           # 128 = one full vreg row / MXU column block

# Row layout of the packed weight block (sublane-aligned starts).
_W1_ROW = 0                                            # fused w_n@w_g1 block-diag
_W1_ROWS = ((FOLD * NODE_IN + 7) // 8) * 8             # 16
_WG2_ROW = _W1_ROW + _W1_ROWS                          # 16
_WO1_ROW = _WG2_ROW + LANES                            # 144
_WPACK_ROWS = _WO1_ROW + LANES                         # 272

# Row layout of the packed bias block (8, LANES).
_B1E_ROW, _BG1_ROW, _BG2_ROW, _BO1_ROW = 0, 1, 2, 3


def simple_gnn_kernel(node_ref, a_ref, gather_ref, wpack_ref, wo2_ref,
                      bpack_ref, out_ref):
    f32 = jnp.float32

    a_norm = a_ref[...]                                # (N, N)
    node_f = node_ref[...]                             # (N, FOLD*NODE_IN)

    w1_blk = wpack_ref[_W1_ROW:_W1_ROW + FOLD * NODE_IN, :]   # (16, 128)
    wg2_blk = wpack_ref[_WG2_ROW:_WG2_ROW + LANES, :]         # (128, 128)
    wo1_blk = wpack_ref[_WO1_ROW:_WO1_ROW + LANES, :]         # (128, 128)
    wo2_blk = wo2_ref[0:LANES, :]                             # (128, FOLD*out)
    b_o2 = wo2_ref[LANES:LANES + 1, :]                        # (1, FOLD*out)

    bp = bpack_ref[...]                                       # (8, 128)
    b1_eff = bp[_B1E_ROW:_B1E_ROW + 1, :]
    b_g1 = bp[_BG1_ROW:_BG1_ROW + 1, :]
    b_g2 = bp[_BG2_ROW:_BG2_ROW + 1, :]
    b_o1 = bp[_BO1_ROW:_BO1_ROW + 1, :]

    # NOTE: the original module also computes edge_embedding(edge_feats), but
    # apply_edges overwrites edata['h'] before it is read -> dead w.r.t. the
    # output and intentionally omitted from the kernel.

    # Fused node_embedding + GraphConv-1 (+ relu):
    #   relu((a_norm @ node) @ (w_n@w_g1) + rowsum(a_norm)*(b_n@w_g1) + b_g1)
    rs = jnp.sum(a_norm, axis=-1, keepdims=True)              # (N, 1)
    h = jnp.dot(a_norm, node_f, preferred_element_type=f32)   # (N, FOLD*4)
    h = jnp.dot(h, w1_blk, preferred_element_type=f32) + rs * b1_eff + b_g1
    h = jnp.maximum(h, 0.0)                                   # (N, 128)

    # GraphConv-2 + relu
    h = jnp.dot(a_norm, h, preferred_element_type=f32)
    h = jnp.maximum(jnp.dot(h, wg2_blk, preferred_element_type=f32) + b_g2, 0.0)

    # apply_edges: h[src] + h[dst] == (src_oh + dst_oh) @ h  (single matmul)
    # TODO(synk): for larger N/E, replace the dense one-hot gather with a
    # scalar-prefetched index gather and tile the edge dimension.
    e = jnp.dot(gather_ref[...], h, preferred_element_type=f32)   # (E, 128)

    # output head: Linear -> ReLU -> Linear (lane-folded over the batch)
    e = jnp.maximum(jnp.dot(e, wo1_blk, preferred_element_type=f32) + b_o1, 0.0)
    out_ref[...] = jnp.dot(e, wo2_blk, preferred_element_type=f32) + b_o2


def _block_diag(w, fold):
    r, c = w.shape
    out = jnp.zeros((fold * r, fold * c), w.dtype)
    for i in range(fold):
        out = out.at[i * r:(i + 1) * r, i * c:(i + 1) * c].set(w)
    return out


def _tile_lanes(v, fold):
    return jnp.tile(jnp.asarray(v, jnp.float32).reshape(1, -1), (1, fold)).reshape(-1)


def pack_params(params):
    f32 = jnp.float32
    out_dim = params["w_o2"].shape[1]

    # Algebraic fusion of node_embedding into GraphConv-1.
    w1 = params["w_n"].astype(f32) @ params["w_g1"].astype(f32)            # (4, H)
    b1_eff = params["b_n"].reshape(1, -1).astype(f32) @ params["w_g1"].astype(f32)

    w_pack = jnp.zeros((_WPACK_ROWS, LANES), f32)
    w_pack = w_pack.at[_W1_ROW:_W1_ROW + FOLD * NODE_IN].set(_block_diag(w1, FOLD))
    w_pack = w_pack.at[_WG2_ROW:_WG2_ROW + LANES].set(
        _block_diag(params["w_g2"].astype(f32), FOLD))
    w_pack = w_pack.at[_WO1_ROW:_WO1_ROW + LANES].set(
        _block_diag(params["w_o1"].astype(f32), FOLD))

    # wo2 block-diag plus its (tiled) bias in the row just below it.
    wo2_pack = jnp.zeros((LANES + 8, FOLD * out_dim), f32)
    wo2_pack = wo2_pack.at[:LANES].set(_block_diag(params["w_o2"].astype(f32), FOLD))
    wo2_pack = wo2_pack.at[LANES].set(_tile_lanes(params["b_o2"], FOLD))

    b_pack = jnp.zeros((8, LANES), f32)
    b_pack = b_pack.at[_B1E_ROW].set(_tile_lanes(b1_eff, FOLD))
    b_pack = b_pack.at[_BG1_ROW].set(_tile_lanes(params["b_g1"], FOLD))
    b_pack = b_pack.at[_BG2_ROW].set(_tile_lanes(params["b_g2"], FOLD))
    b_pack = b_pack.at[_BO1_ROW].set(_tile_lanes(params["b_o1"], FOLD))
    return w_pack, wo2_pack, b_pack


def simple_gnn_forward(node_feats, a_norm, gather_oh, params):
    """node_feats (B,N,4), a_norm (N,N), gather_oh (E,N) -> (B,E,out_dim)."""
    B, N, _ = node_feats.shape
    E = gather_oh.shape[0]
    out_dim = params["w_o2"].shape[1]
    w_out = FOLD * out_dim

    w_pack, wo2_pack, b_pack = pack_params(params)

    # Pad B to a multiple of FOLD, then fold the batch into the lane axis.
    Bp = -(-B // FOLD) * FOLD
    if Bp != B:
        pad = jnp.zeros((Bp - B, N, node_feats.shape[-1]), node_feats.dtype)
        node_feats = jnp.concatenate([node_feats, pad], axis=0)
    bblk = Bp // FOLD
    node_f = (node_feats.reshape(bblk, FOLD, N, NODE_IN)
              .transpose(0, 2, 1, 3).reshape(bblk, N, FOLD * NODE_IN))

    out = pl.pallas_call(
        simple_gnn_kernel,
        out_shape=jax.ShapeDtypeStruct((bblk, E, w_out), jnp.float32),
        grid=(bblk,),
        in_specs=[
            pl.BlockSpec((None, N, FOLD * NODE_IN), lambda g: (g, 0, 0)),
            # Shared across all grid steps: constant index maps keep these
            # VMEM-resident (no per-step DMA) exactly like the weight blocks.
            pl.BlockSpec((N, N), lambda g: (0, 0)),
            pl.BlockSpec((E, N), lambda g: (0, 0)),
            pl.BlockSpec((_WPACK_ROWS, LANES), lambda g: (0, 0)),
            pl.BlockSpec((LANES + 8, w_out), lambda g: (0, 0)),
            pl.BlockSpec((8, LANES), lambda g: (0, 0)),
        ],
        out_specs=pl.BlockSpec((None, E, w_out), lambda g: (g, 0, 0)),
        compiler_params=pltpu.CompilerParams(
            dimension_semantics=("parallel",)),
    )(node_f, a_norm, gather_oh, w_pack, wo2_pack, b_pack)

    # Un-interleave the lane-folded batch: (bblk, E, FOLD*out) -> (B, E, out).
    out = (out.reshape(bblk, E, FOLD, out_dim)
           .transpose(0, 2, 1, 3).reshape(Bp, E, out_dim))
    return out[:B]


def _mm(a, b):
    return jnp.matmul(a, b, precision=jax.lax.Precision.HIGHEST)


def reference_forward(node_feats, a_norm, src, dst, params):
    """Pure-JAX reference matching DGL GraphConv(norm='both') semantics."""
    h = _mm(node_feats, params["w_n"]) + params["b_n"]
    for wg, bg in ((params["w_g1"], params["b_g1"]),
                   (params["w_g2"], params["b_g2"])):
        h = jnp.maximum(_mm(_mm(a_norm, h), wg) + bg, 0.0)
    e = h[src] + h[dst]
    e = jnp.maximum(_mm(e, params["w_o1"]) + params["b_o1"], 0.0)
    return _mm(e, params["w_o2"]) + params["b_o2"]


if __name__ == "__main__":
    B = 4           # graph instances (folded into one 128-lane grid step)
    N = 16          # nodes per graph
    IN_DIM = 8      # edge feature dim (edge_embedding input; dead wrt output)
    OUT_DIM = 4

    key = jax.random.PRNGKey(0)
    ks = jax.random.split(key, 16)

    # Fully-connected directed graph without self-loops (typical TSP graph).
    src_l, dst_l = [], []
    for s in range(N):
        for d in range(N):
            if s != d:
                src_l.append(s)
                dst_l.append(d)
    src = jnp.asarray(src_l, dtype=jnp.int32)
    dst = jnp.asarray(dst_l, dtype=jnp.int32)
    E = src.shape[0]  # 240

    adj = jnp.zeros((N, N), jnp.float32).at[dst, src].set(1.0)  # adj[dst, src]
    in_deg = jnp.maximum(adj.sum(axis=1), 1.0)
    out_deg = jnp.maximum(adj.sum(axis=0), 1.0)
    a_norm = (in_deg[:, None] ** -0.5) * adj * (out_deg[None, :] ** -0.5)

    # Merged src/dst one-hot gather: (src_oh + dst_oh) @ h == h[src] + h[dst].
    gather_oh = (jax.nn.one_hot(src, N, dtype=jnp.float32)
                 + jax.nn.one_hot(dst, N, dtype=jnp.float32))

    node_feats = jax.random.normal(ks[1], (B, N, NODE_IN), jnp.float32)

    # edge_feats feeds edge_embedding, whose result the original forward
    # overwrites before reading -> intentionally not passed to the kernel.
    _edge_feats = jax.random.normal(ks[0], (B, E, IN_DIM), jnp.float32)

    def lin(kw, kb, fan_in, fan_out):
        w = jax.random.normal(kw, (fan_in, fan_out), jnp.float32) * 0.1
        b = jax.random.normal(kb, (1, fan_out), jnp.float32) * 0.1
        return w, b

    w_n, b_n = lin(ks[4], ks[5], NODE_IN, HIDDEN)      # node_embedding
    w_g1, b_g1 = lin(ks[6], ks[7], HIDDEN, HIDDEN)     # GraphConv 1
    w_g2, b_g2 = lin(ks[8], ks[9], HIDDEN, HIDDEN)     # GraphConv 2
    w_o1, b_o1 = lin(ks[10], ks[11], HIDDEN, HIDDEN)   # output[0]
    w_o2, b_o2 = lin(ks[12], ks[13], HIDDEN, OUT_DIM)  # output[2]

    params = dict(w_n=w_n, b_n=b_n, w_g1=w_g1, b_g1=b_g1, w_g2=w_g2, b_g2=b_g2,
                  w_o1=w_o1, b_o1=b_o1, w_o2=w_o2, b_o2=b_o2)

    out = simple_gnn_forward(node_feats, a_norm, gather_oh, params)
    out = jax.block_until_ready(out)

    ref = jax.vmap(
        lambda nf: reference_forward(nf, a_norm, src, dst, params))(node_feats)

    assert out.shape == (B, E, OUT_DIM)
    max_err = float(jnp.max(jnp.abs(out - ref)))
    # Kernel matmuls use default MXU precision while the reference uses
    # Precision.HIGHEST; tolerance deliberately relaxed to 1e-3.
    assert jnp.allclose(out, ref, rtol=1e-3, atol=1e-3), max_err

    print("KERNEL_OK")
</pallas_src>

<mosaic_0001>
module attributes {stable_mosaic.version = 11 : i64} {
  func.func @simple_gnn_kernel(%arg0: i32, %arg1: memref<1x16x16xf32, #tpu.memory_space<vmem>>, %arg2: memref<16x16xf32, #tpu.memory_space<vmem>>, %arg3: memref<240x16xf32, #tpu.memory_space<vmem>>, %arg4: memref<272x128xf32, #tpu.memory_space<vmem>>, %arg5: memref<136x16xf32, #tpu.memory_space<vmem>>, %arg6: memref<8x128xf32, #tpu.memory_space<vmem>>, %arg7: memref<1x240x16xf32, #tpu.memory_space<vmem>>) attributes {dimension_semantics = [#tpu.dimension_semantics<parallel>], iteration_bounds = array<i64: 1>, scalar_prefetch = 0 : i64, scratch_operands = 0 : i64, tpu.core_type = #tpu.core_type<tc>, window_params = [{transform_indices = @transform_0, window_bounds = array<i64: 1, 16, 16>}, {pipeline_mode = #tpu.pipeline_mode<synchronous>, transform_indices = @transform_1, window_bounds = array<i64: 16, 16>}, {pipeline_mode = #tpu.pipeline_mode<synchronous>, transform_indices = @transform_2, window_bounds = array<i64: 240, 16>}, {pipeline_mode = #tpu.pipeline_mode<synchronous>, transform_indices = @transform_3, window_bounds = array<i64: 272, 128>}, {pipeline_mode = #tpu.pipeline_mode<synchronous>, transform_indices = @transform_4, window_bounds = array<i64: 136, 16>}, {pipeline_mode = #tpu.pipeline_mode<synchronous>, transform_indices = @transform_5, window_bounds = array<i64: 8, 128>}, {transform_indices = @transform_6, window_bounds = array<i64: 1, 240, 16>}]} {
    %c0 = arith.constant 0 : index
    %c0_0 = arith.constant 0 : index
    %0 = vector.load %arg2[%c0, %c0_0] : memref<16x16xf32, #tpu.memory_space<vmem>>, vector<16x16xf32>
    %c0_1 = arith.constant 0 : index
    %c0_2 = arith.constant 0 : index
    %c0_3 = arith.constant 0 : index
    %1 = vector.load %arg1[%c0_1, %c0_2, %c0_3] : memref<1x16x16xf32, #tpu.memory_space<vmem>>, vector<1x16x16xf32>
    %2 = vector.shape_cast %1 : vector<1x16x16xf32> to vector<16x16xf32>
    %c0_4 = arith.constant 0 : index
    %c0_5 = arith.constant 0 : index
    %3 = vector.load %arg4[%c0_4, %c0_5] : memref<272x128xf32, #tpu.memory_space<vmem>>, vector<16x128xf32>
    %c16 = arith.constant 16 : index
    %c0_6 = arith.constant 0 : index
    %4 = vector.load %arg4[%c16, %c0_6] : memref<272x128xf32, #tpu.memory_space<vmem>>, vector<128x128xf32>
    %c144 = arith.constant 144 : index
    %c0_7 = arith.constant 0 : index
    %5 = vector.load %arg4[%c144, %c0_7] : memref<272x128xf32, #tpu.memory_space<vmem>>, vector<128x128xf32>
    %c0_8 = arith.constant 0 : index
    %c0_9 = arith.constant 0 : index
    %6 = vector.load %arg5[%c0_8, %c0_9] : memref<136x16xf32, #tpu.memory_space<vmem>>, vector<128x16xf32>
    %c128 = arith.constant 128 : index
    %c0_10 = arith.constant 0 : index
    %7 = vector.load %arg5[%c128, %c0_10] : memref<136x16xf32, #tpu.memory_space<vmem>>, vector<1x16xf32>
    %c0_11 = arith.constant 0 : index
    %c0_12 = arith.constant 0 : index
    %8 = vector.load %arg6[%c0_11, %c0_12] : memref<8x128xf32, #tpu.memory_space<vmem>>, vector<8x128xf32>
    %9 = vector.extract_strided_slice %8 {offsets = [0, 0], sizes = [1, 128], strides = [1, 1]} : vector<8x128xf32> to vector<1x128xf32>
    %10 = vector.extract_strided_slice %8 {offsets = [1, 0], sizes = [1, 128], strides = [1, 1]} : vector<8x128xf32> to vector<1x128xf32>
    %11 = vector.extract_strided_slice %8 {offsets = [2, 0], sizes = [1, 128], strides = [1, 1]} : vector<8x128xf32> to vector<1x128xf32>
    %12 = vector.extract_strided_slice %8 {offsets = [3, 0], sizes = [1, 128], strides = [1, 1]} : vector<8x128xf32> to vector<1x128xf32>
    %cst = arith.constant dense<0.000000e+00> : vector<16xf32>
    %13 = vector.multi_reduction <add>, %0, %cst [1] : vector<16x16xf32> to vector<16xf32>
    %14 = vector.shape_cast %13 : vector<16xf32> to vector<16x1xf32>
    %cst_13 = arith.constant dense<0.000000e+00> : vector<16x16xf32>
    %15 = tpu.matmul %0, %2, %cst_13 {dimension_numbers = #tpu.dot_dimension_numbers<[1], [0], [0], [1], [0, 0, 1, 1], [], []>} : vector<16x16xf32>, vector<16x16xf32>, vector<16x16xf32> -> vector<16x16xf32>
    %cst_14 = arith.constant dense<0.000000e+00> : vector<16x128xf32>
    %16 = tpu.matmul %15, %3, %cst_14 {dimension_numbers = #tpu.dot_dimension_numbers<[1], [0], [0], [1], [0, 0, 1, 1], [], []>} : vector<16x16xf32>, vector<16x128xf32>, vector<16x128xf32> -> vector<16x128xf32>
    %17 = vector.broadcast %14 : vector<16x1xf32> to vector<16x128xf32>
    %18 = vector.broadcast %9 : vector<1x128xf32> to vector<16x128xf32>
    %19 = arith.mulf %17, %18 : vector<16x128xf32>
    %20 = arith.addf %16, %19 : vector<16x128xf32>
    %21 = vector.broadcast %10 : vector<1x128xf32> to vector<16x128xf32>
    %22 = arith.addf %20, %21 : vector<16x128xf32>
    %cst_15 = arith.constant 0.000000e+00 : f32
    %23 = vector.broadcast %cst_15 : f32 to vector<16x128xf32>
    %24 = arith.maximumf %22, %23 : vector<16x128xf32>
    %cst_16 = arith.constant dense<0.000000e+00> : vector<16x128xf32>
    %25 = tpu.matmul %0, %24, %cst_16 {dimension_numbers = #tpu.dot_dimension_numbers<[1], [0], [0], [1], [0, 0, 1, 1], [], []>} : vector<16x16xf32>, vector<16x128xf32>, vector<16x128xf32> -> vector<16x128xf32>
    %cst_17 = arith.constant dense<0.000000e+00> : vector<16x128xf32>
    %26 = tpu.matmul %25, %4, %cst_17 {dimension_numbers = #tpu.dot_dimension_numbers<[1], [0], [0], [1], [0, 0, 1, 1], [], []>} : vector<16x128xf32>, vector<128x128xf32>, vector<16x128xf32> -> vector<16x128xf32>
    %27 = vector.broadcast %11 : vector<1x128xf32> to vector<16x128xf32>
    %28 = arith.addf %26, %27 : vector<16x128xf32>
    %cst_18 = arith.constant 0.000000e+00 : f32
    %29 = vector.broadcast %cst_18 : f32 to vector<16x128xf32>
    %30 = arith.maximumf %28, %29 : vector<16x128xf32>
    %c0_19 = arith.constant 0 : index
    %c0_20 = arith.constant 0 : index
    %31 = vector.load %arg3[%c0_19, %c0_20] : memref<240x16xf32, #tpu.memory_space<vmem>>, vector<240x16xf32>
    %cst_21 = arith.constant dense<0.000000e+00> : vector<240x128xf32>
    %32 = tpu.matmul %31, %30, %cst_21 {dimension_numbers = #tpu.dot_dimension_numbers<[1], [0], [0], [1], [0, 0, 1, 1], [], []>} : vector<240x16xf32>, vector<16x128xf32>, vector<240x128xf32> -> vector<240x128xf32>
    %cst_22 = arith.constant dense<0.000000e+00> : vector<240x128xf32>
    %33 = tpu.matmul %32, %5, %cst_22 {dimension_numbers = #tpu.dot_dimension_numbers<[1], [0], [0], [1], [0, 0, 1, 1], [], []>} : vector<240x128xf32>, vector<128x128xf32>, vector<240x128xf32> -> vector<240x128xf32>
    %34 = vector.broadcast %12 : vector<1x128xf32> to vector<240x128xf32>
    %35 = arith.addf %33, %34 : vector<240x128xf32>
    %cst_23 = arith.constant 0.000000e+00 : f32
    %36 = vector.broadcast %cst_23 : f32 to vector<240x128xf32>
    %37 = arith.maximumf %35, %36 : vector<240x128xf32>
    %cst_24 = arith.constant dense<0.000000e+00> : vector<240x16xf32>
    %38 = tpu.matmul %37, %6, %cst_24 {dimension_numbers = #tpu.dot_dimension_numbers<[1], [0], [0], [1], [0, 0, 1, 1], [], []>} : vector<240x128xf32>, vector<128x16xf32>, vector<240x16xf32> -> vector<240x16xf32>
    %39 = vector.broadcast %7 : vector<1x16xf32> to vector<240x16xf32>
    %40 = arith.addf %38, %39 : vector<240x16xf32>
    %c0_25 = arith.constant 0 : index
    %c0_26 = arith.constant 0 : index
    %c0_27 = arith.constant 0 : index
    %41 = vector.load %arg7[%c0_25, %c0_26, %c0_27] : memref<1x240x16xf32, #tpu.memory_space<vmem>>, vector<1x240x16xf32>
    %42 = vector.shape_cast %41 : vector<1x240x16xf32> to vector<240x16xf32>
    %43 = vector.shape_cast %40 : vector<240x16xf32> to vector<1x240x16xf32>
    tpu.vector_store %arg7[%c0_25, %c0_26, %c0_27], %43 {strides = array<i32>} : memref<1x240x16xf32, #tpu.memory_space<vmem>>, vector<1x240x16xf32>,
    return
  }
  func.func @transform_0(%arg0: i32) -> (i32, i32, i32) {
    %c0_i32 = arith.constant 0 : i32
    %c0_i32_0 = arith.constant 0 : i32
    %c0_i32_1 = arith.constant 0 : i32
    return %arg0, %c0_i32, %c0_i32_0 : i32, i32, i32
  }
  func.func @transform_1(%arg0: i32) -> (i32, i32) {
    %c0_i32 = arith.constant 0 : i32
    %c0_i32_0 = arith.constant 0 : i32
    %c0_i32_1 = arith.constant 0 : i32
    return %c0_i32, %c0_i32_0 : i32, i32
  }
  func.func @transform_2(%arg0: i32) -> (i32, i32) {
    %c0_i32 = arith.constant 0 : i32
    %c0_i32_0 = arith.constant 0 : i32
    %c0_i32_1 = arith.constant 0 : i32
    return %c0_i32, %c0_i32_0 : i32, i32
  }
  func.func @transform_3(%arg0: i32) -> (i32, i32) {
    %c0_i32 = arith.constant 0 : i32
    %c0_i32_0 = arith.constant 0 : i32
    %c0_i32_1 = arith.constant 0 : i32
    return %c0_i32, %c0_i32_0 : i32, i32
  }
  func.func @transform_4(%arg0: i32) -> (i32, i32) {
    %c0_i32 = arith.constant 0 : i32
    %c0_i32_0 = arith.constant 0 : i32
    %c0_i32_1 = arith.constant 0 : i32
    return %c0_i32, %c0_i32_0 : i32, i32
  }
  func.func @transform_5(%arg0: i32) -> (i32, i32) {
    %c0_i32 = arith.constant 0 : i32
    %c0_i32_0 = arith.constant 0 : i32
    %c0_i32_1 = arith.constant 0 : i32
    return %c0_i32, %c0_i32_0 : i32, i32
  }
  func.func @transform_6(%arg0: i32) -> (i32, i32, i32) {
    %c0_i32 = arith.constant 0 : i32
    %c0_i32_0 = arith.constant 0 : i32
    %c0_i32_1 = arith.constant 0 : i32
    return %arg0, %c0_i32, %c0_i32_0 : i32, i32, i32
  }
}

</mosaic_0001>

<bundles_post_ra>
// kernel: tpu_custom_call.1
= control target key start
LH: loop header
LB: loop body
LE: loop exit
PB: predicated region body
PF: predicated region fallthrough
CT: control target
= control target key end

     0   :  { %vm79_vm0 = vcmask 130048   ;;  %v167_v36 = vlaneseq  ;;  %s2349_s0 = inlined_call_operand.vmem [shape: f32[1,16,16], index: 0, kind: input, shape index: {}]   ;;  %s2350_s1 = inlined_call_operand.vmem [shape: f32[16,16], index: 1, kind: input, shape index: {}]   ;;  %s2351_s3 = inlined_call_operand.vmem [shape: f32[272,128], index: 3, kind: input, shape index: {}]   ;;  %s2352_s5 = inlined_call_operand.vmem [shape: f32[8,128], index: 5, kind: input, shape index: {}]   ;;  %s2353_s2 = inlined_call_operand.vmem [shape: f32[240,16], index: 2, kind: input, shape index: {}]   ;;  %s2354_s4 = inlined_call_operand.vmem [shape: f32[136,16], index: 4, kind: input, shape index: {}]   ;;  %s2355_s6 = inlined_call_operand.vmem [shape: f32[1,240,16], index: 6, kind: output, shape index: {}]  }
   0x1   :  { %v25_v0 = vld [vmem:[%s2349_s0] sm:$0xff]  ;;  %v26_v1 = vld [vmem:[%s2349_s0 + $0x8] sm:$0xff]  ;;  %v29_v12 = vld [vmem:[%s2351_s3 + $0x10] sm:$0xff] }
   0x2   :  { %v23_v2 = vld [vmem:[%s2350_s1] sm:$0xff]  ;;  %v1705_v3 = vpack.c.bf16 %v26_v1, %v25_v0  ;;  %v28_v5 = vld [vmem:[%s2351_s3 + $0x8] sm:$0xff]  ;;  %v30_v13 = vld [vmem:[%s2351_s3 + $0x18] sm:$0xff]  ;;  %v1929_v37 = vshrl.u32 %v167_v36, 7 }
   0x3   :  { %1450 = vmatprep.mubr.msk.f32.mxu0 %vm79_vm0, %v23_v2  ;;  %v27_v4 = vld [vmem:[%s2351_s3] sm:$0xff]  ;;  %v1871_v7 = vld [vmem:[%s2350_s1 + $0x8] sm:$0xff]  ;;  %v80_v8 = vsel %vm79_vm0, %v23_v2, 0.0  ;;  %v1717_v15 = vpack.c.bf16 %v30_v13, %v29_v12  ;;  %v33_v18 = vld [vmem:[%s2351_s3 + $0x30] sm:$0xff] }
   0x4   :  { %v1709_v6 = vpack.c.bf16 %v28_v5, %v27_v4  ;;  %1706 = vmatprep.subr.bf16.mxu0 %v1705_v3  ;;  %81 = vadd.xlane.f32.xlu0 %v80_v8  ;;  %v83_v9 = vsel %vm79_vm0, %v1871_v7, 0.0  ;;  %v31_v14 = vld [vmem:[%s2351_s3 + $0x20] sm:$0xff]  ;;  %v32_v16 = vld [vmem:[%s2351_s3 + $0x28] sm:$0xff]  ;;  %v34_v19 = vld [vmem:[%s2351_s3 + $0x38] sm:$0xff]  ;;  %v169_v39 = vsub.s32 0, %v1929_v37  ;;  %v256_v43 = vsub.s32 1, %v1929_v37 }
   0x5   :  { %1708 = vmatpush3.bf16.msra.mxu0 %v1705_v3  ;;  %v1721_v17 = vpack.c.bf16 %v32_v16, %v31_v14  ;;  %v1725_v20 = vpack.c.bf16 %v34_v19, %v33_v18  ;;  %v35_v21 = vld [vmem:[%s2351_s3 + $0x40] sm:$0xff]  ;;  %v36_v22 = vld [vmem:[%s2351_s3 + $0x48] sm:$0xff]  ;;  %v37_v24 = vld [vmem:[%s2351_s3 + $0x50] sm:$0xff]  ;;  %v339_v19 = vsub.s32 2, %v1929_v37 }
   0x6   :  { %1710 = vmatprep.subr.bf16.mxu1 %v1709_v6  ;;  %v1729_v23 = vpack.c.bf16 %v36_v22, %v35_v21  ;;  %v38_v25 = vld [vmem:[%s2351_s3 + $0x58] sm:$0xff]  ;;  %v39_v27 = vld [vmem:[%s2351_s3 + $0x60] sm:$0xff]  ;;  %v40_v28 = vld [vmem:[%s2351_s3 + $0x68] sm:$0xff] }
   0x7   :  { %1712 = vmatpush3.bf16.msra.mxu1 %v1709_v6  ;;  %v1733_v26 = vpack.c.bf16 %v38_v25, %v37_v24  ;;  %v1737_v29 = vpack.c.bf16 %v40_v28, %v39_v27  ;;  %v41_v30 = vld [vmem:[%s2351_s3 + $0x70] sm:$0xff]  ;;  %v42_v31 = vld [vmem:[%s2351_s3 + $0x78] sm:$0xff]  ;;  %v43_v33 = vld [vmem:[%s2351_s3 + $0x80] sm:$0xff] }
   0x8   :  { %1451 = vmatmul.mubr.msk.f32.vlgmr.msra.gmra.mrb[0].mxu0 %vm79_vm0, %v1871_v7  ;;  %84 = vadd.xlane.f32.xlu0 %v83_v9  ;;  %v1741_v32 = vpack.c.bf16 %v42_v31, %v41_v30  ;;  %v44_v34 = vld [vmem:[%s2351_s3 + $0x88] sm:$0xff]  ;;  %v1935_v40 = vld [vmem:[%s2352_s5] sm:$0xff]  ;;  %v45_v59 = vld [vmem:[%s2351_s3 + $0x90] sm:$0xff] }
   0x9   :  { %1464 = vmatprep.mubr.msk.f32.mxu0 %vm79_vm0, %v23_v2  ;;  %1718 = vmatprep.subr.bf16.mxu1 %v1717_v15  ;;  %v1745_v35 = vpack.c.bf16 %v44_v34, %v43_v33  ;;  %v170_v42 = vrot.slane %v1935_v40, %v169_v39  ;;  %v257_v45 = vrot.slane %v1935_v40, %v256_v43  ;;  %v418_v58 = vld [vmem:[%s2353_s2] sm:$0xff]  ;;  %v46_v60 = vld [vmem:[%s2351_s3 + $0x98] sm:$0xff]  ;;  %v48_v63 = vld [vmem:[%s2351_s3 + $0xa8] sm:$0xff] }
   0xa   :  { %v47_v61 = vld [vmem:[%s2351_s3 + $0xa0] sm:$0xff]  ;;  %v1753_v62 = vpack.c.bf16 %v46_v60, %v45_v59  ;;  %v49_v1 = vld [vmem:[%s2351_s3 + $0xb0] sm:$0xff]  ;;  %v50_v2 = vld [vmem:[%s2351_s3 + $0xb8] sm:$0xff] }
   0xb   :  { %v1757_v0 = vpack.c.bf16 %v48_v63, %v47_v61  ;;  %v1761_v3 = vpack.c.bf16 %v50_v2, %v49_v1  ;;  %v51_v4 = vld [vmem:[%s2351_s3 + $0xc0] sm:$0xff]  ;;  %v52_v5 = vld [vmem:[%s2351_s3 + $0xc8] sm:$0xff]  ;;  %v54_v8 = vld [vmem:[%s2351_s3 + $0xd8] sm:$0xff] }
   0xc   :  { %v1765_v6 = vpack.c.bf16 %v52_v5, %v51_v4  ;;  %v57_v13 = vld [vmem:[%s2351_s3 + $0xf0] sm:$0xff]  ;;  %v58_v14 = vld [vmem:[%s2351_s3 + $0xf8] sm:$0xff]  ;;  %v59_v16 = vld [vmem:[%s2351_s3 + $0x100] sm:$0xff] }
   0xd   :  { %v419_v28 = vld [vmem:[%s2353_s2 + $0x8] sm:$0xff]  ;;  %v421_v30 = vld [vmem:[%s2353_s2 + $0x18] sm:$0xff]  ;;  %v422_v31 = vld [vmem:[%s2353_s2 + $0x20] sm:$0xff] }
   0xe   :  { %v424_v33 = vld [vmem:[%s2353_s2 + $0x30] sm:$0xff]  ;;  %v425_v34 = vld [vmem:[%s2353_s2 + $0x38] sm:$0xff]  ;;  %v427_v36 = vld [vmem:[%s2353_s2 + $0x48] sm:$0xff] }
   0xf   :  { %v429_v39 = vld [vmem:[%s2353_s2 + $0x58] sm:$0xff]  ;;  %v432_v43 = vld [vmem:[%s2353_s2 + $0x70] sm:$0xff]  ;;  %v61_v59 = vld [vmem:[%s2354_s4] sm:$0xff] }
  0x10   :  { %v62_v60 = vld [vmem:[%s2354_s4 + $0x8] sm:$0xff]  ;;  %v63_v61 = vld [vmem:[%s2354_s4 + $0x10] sm:$0xff]  ;;  %v64_v63 = vld [vmem:[%s2354_s4 + $0x18] sm:$0xff] }
  0x11   :  { %v65_v1 = vld [vmem:[%s2354_s4 + $0x20] sm:$0xff]  ;;  %v66_v2 = vld [vmem:[%s2354_s4 + $0x28] sm:$0xff]  ;;  %v67_v4 = vld [vmem:[%s2354_s4 + $0x30] sm:$0xff] }
  0x12   :  { %v68_v5 = vld [vmem:[%s2354_s4 + $0x38] sm:$0xff] }
  0x91   :  { %v82_v38 = vpop.xlane.xlu0 %81 }
  0x92   :  { %v171_v46 = vmul.f32 %v170_v42, %v82_v38  ;;  %v428_v38 = vld [vmem:[%s2353_s2 + $0x50] sm:$0xff] }
  0x95   :  { %v85_v41 = vpop.xlane.xlu0 %84 }
  0x96   :  { %v172_v44 = vmul.f32 %v170_v42, %v85_v41  ;;  %v430_v41 = vld [vmem:[%s2353_s2 + $0x60] sm:$0xff]  ;;  %v431_v42 = vld [vmem:[%s2353_s2 + $0x68] sm:$0xff] }
  0xdb   :  { %v1452_v10 = vpop.f32.mrb[0].mxu0 }
  0xdc   :  { %v158_v11 = vpop.f32.mrb[1].mxu0 }
  0xdd   :  { %1457 = vmatprep.mubr.msk.f32.mxu1 %vm79_vm0, %v158_v11  ;;  %v56_v11 = vld [vmem:[%s2351_s3 + $0xe8] sm:$0xff] }
  0xde   :  { %1458 = vmatmul.mubr.msk.f32.vlgmr.msra.gmra.mrb[0].mxu1 %vm79_vm0, %v1452_v10  ;;  %v55_v10 = vld [vmem:[%s2351_s3 + $0xe0] sm:$0xff] }
  0xdf   :  { %1720 = vmatpush3.bf16.msra.mxu1 %v1717_v15  ;;  %v1773_v12 = vpack.c.bf16 %v56_v11, %v55_v10  ;;  %v1777_v15 = vpack.c.bf16 %v58_v14, %v57_v13  ;;  %v71_v10 = vld [vmem:[%s2354_s4 + $0x50] sm:$0xff]  ;;  %v72_v11 = vld [vmem:[%s2354_s4 + $0x58] sm:$0xff]  ;;  %v73_v13 = vld [vmem:[%s2354_s4 + $0x60] sm:$0xff] }
  0xe0   :  { %1722 = vmatprep.subr.bf16.mxu1 %v1721_v17  ;;  %v74_v14 = vld [vmem:[%s2354_s4 + $0x68] sm:$0xff] }
  0xe3   :  { %1724 = vmatpush3.bf16.msra.mxu1 %v1721_v17  ;;  %v60_v17 = vld [vmem:[%s2351_s3 + $0x108] sm:$0xff] }
  0xe4   :  { %1726 = vmatprep.subr.bf16.mxu1 %v1725_v20  ;;  %v1781_v18 = vpack.c.bf16 %v60_v17, %v59_v16 }
  0xe7   :  { %1728 = vmatpush3.bf16.msra.mxu1 %v1725_v20  ;;  %v340_v20 = vrot.slane %v1935_v40, %v339_v19 }
  0xe8   :  { %1730 = vmatprep.subr.bf16.mxu1 %v1729_v23 }
  0xeb   :  { %1732 = vmatpush3.bf16.msra.mxu1 %v1729_v23 }
  0xec   :  { %1734 = vmatprep.subr.bf16.mxu1 %v1733_v26 }
  0xef   :  { %1736 = vmatpush3.bf16.msra.mxu1 %v1733_v26 }
  0xf0   :  { %1738 = vmatprep.subr.bf16.mxu1 %v1737_v29 }
  0xf3   :  { %1740 = vmatpush3.bf16.msra.mxu1 %v1737_v29  ;;  %v420_v29 = vld [vmem:[%s2353_s2 + $0x10] sm:$0xff] }
  0xf4   :  { %1742 = vmatprep.subr.bf16.mxu1 %v1741_v32 }
  0xf7   :  { %1744 = vmatpush3.bf16.msra.mxu1 %v1741_v32  ;;  %v423_v32 = vld [vmem:[%s2353_s2 + $0x28] sm:$0xff] }
  0xf8   :  { %1746 = vmatprep.subr.bf16.mxu1 %v1745_v35 }
  0xfb   :  { %1748 = vmatpush3.bf16.msra.mxu1 %v1745_v35  ;;  %v426_v35 = vld [vmem:[%s2353_s2 + $0x40] sm:$0xff] }
  0xfc   :  { %1754 = vmatprep.subr.bf16.mxu1 %v1753_v62 }
 0x1b1   :  { %v1459_v47 = vpop.f32.mrb[0].mxu1 }
 0x1b2   :  { %v251_v48 = vadd.f32 %v1459_v47, %v172_v44  ;;  %v245_v49 = vpop.f32.mrb[1].mxu1  ;;  %v433_v44 = vld [vmem:[%s2353_s2 + $0x78] sm:$0xff]  ;;  %v436_v47 = vld [vmem:[%s2353_s2 + $0x90] sm:$0xff] }
 0x1b3   :  { %v246_v50 = vadd.f32 %v245_v49, %v171_v46  ;;  %v435_v46 = vld [vmem:[%s2353_s2 + $0x88] sm:$0xff]  ;;  %v438_v49 = vld [vmem:[%s2353_s2 + $0xa0] sm:$0xff] }
 0x1b4   :  { %v259_v51 = vadd.f32 %v257_v45, %v251_v48  ;;  %v437_v48 = vld [vmem:[%s2353_s2 + $0x98] sm:$0xff] }
 0x1b5   :  { %v258_v52 = vadd.f32 %v257_v45, %v246_v50  ;;  %v434_v45 = vld [vmem:[%s2353_s2 + $0x80] sm:$0xff]  ;;  %v439_v50 = vld [vmem:[%s2353_s2 + $0xa8] sm:$0xff] }
 0x1b6   :  { %v261_v53 = vmax.f32 %v259_v51, 0.0  ;;  %v440_v51 = vld [vmem:[%s2353_s2 + $0xb0] sm:$0xff] }
 0x1b7   :  { %v260_v54 = vmax.f32 %v258_v52, 0.0  ;;  %v441_v52 = vld [vmem:[%s2353_s2 + $0xb8] sm:$0xff] }
 0x1b9   :  { %v1713_v55 = vpack.c.bf16 %v261_v53, %v260_v54  ;;  %v442_v53 = vld [vmem:[%s2353_s2 + $0xc0] sm:$0xff]  ;;  %v443_v54 = vld [vmem:[%s2353_s2 + $0xc8] sm:$0xff] }
 0x1bb   :  { %1714 = vmatprep.subr.bf16.mxu0 %v1713_v55 }
 0x1bc   :  { %1716 = vmatpush3.bf16.msra.mxu0 %v1713_v55  ;;  %v444_v55 = vld [vmem:[%s2353_s2 + $0xd0] sm:$0xff] }
 0x1bf   :  { %1465 = vmatmul.mubr.msk.f32.vlgmr.msra.gmra.mrb[2].mxu0 %vm79_vm0, %v1871_v7  ;;  %v53_v7 = vld [vmem:[%s2351_s3 + $0xd0] sm:$0xff] }
 0x1c0   :  { %1506 = vmatprep.mubr.msk.f32.mxu0 %vm79_vm0, %v418_v58  ;;  %v1769_v9 = vpack.c.bf16 %v54_v8, %v53_v7  ;;  %v447_v58 = vld [vmem:[%s2353_s2 + $0xe8] sm:$0xff]  ;;  %v69_v7 = vld [vmem:[%s2354_s4 + $0x40] sm:$0xff] }
 0x1c1   :  { %v70_v8 = vld [vmem:[%s2354_s4 + $0x48] sm:$0xff] }
 0x292   :  { %v1466_v56 = vpop.f32.mrb[2].mxu0 }
 0x293   :  { %v328_v57 = vpop.f32.mrb[3].mxu0 }
 0x294   :  { %1499 = vmatprep.mubr.f32.mxu1 %v328_v57  ;;  %v446_v57 = vld [vmem:[%s2353_s2 + $0xe0] sm:$0xff] }
 0x295   :  { %1500 = vmatmul.mubr.f32.vlgmr.msra.gmra.mrb[2].mxu1 %v1466_v56  ;;  %v445_v56 = vld [vmem:[%s2353_s2 + $0xd8] sm:$0xff] }
 0x296   :  { %1756 = vmatpush3.bf16.msra.mxu1 %v1753_v62  ;;  %v1785_v62 = vpack.c.bf16 %v62_v60, %v61_v59 }
 0x297   :  { %1758 = vmatprep.subr.bf16.mxu1 %v1757_v0 }
 0x29a   :  { %1760 = vmatpush3.bf16.msra.mxu1 %v1757_v0  ;;  %v1789_v0 = vpack.c.bf16 %v64_v63, %v63_v61 }
 0x29b   :  { %1762 = vmatprep.subr.bf16.mxu1 %v1761_v3 }
 0x29e   :  { %1764 = vmatpush3.bf16.msra.mxu1 %v1761_v3  ;;  %v1793_v3 = vpack.c.bf16 %v66_v2, %v65_v1 }
 0x29f   :  { %1766 = vmatprep.subr.bf16.mxu1 %v1765_v6 }
 0x2a2   :  { %1768 = vmatpush3.bf16.msra.mxu1 %v1765_v6  ;;  %v1797_v6 = vpack.c.bf16 %v68_v5, %v67_v4 }
 0x2a3   :  { %1770 = vmatprep.subr.bf16.mxu1 %v1769_v9 }
 0x2a6   :  { %1772 = vmatpush3.bf16.msra.mxu1 %v1769_v9  ;;  %v1801_v9 = vpack.c.bf16 %v70_v8, %v69_v7 }
 0x2a7   :  { %1774 = vmatprep.subr.bf16.mxu1 %v1773_v12 }
 0x2aa   :  { %1776 = vmatpush3.bf16.msra.mxu1 %v1773_v12  ;;  %v1805_v12 = vpack.c.bf16 %v72_v11, %v71_v10 }
 0x2ab   :  { %1778 = vmatprep.subr.bf16.mxu1 %v1777_v15 }
 0x2ae   :  { %1780 = vmatpush3.bf16.msra.mxu1 %v1777_v15  ;;  %v1809_v15 = vpack.c.bf16 %v74_v14, %v73_v13 }
 0x2af   :  { %1782 = vmatprep.subr.bf16.mxu1 %v1781_v18 }
 0x2b2   :  { %1784 = vmatpush3.bf16.msra.mxu1 %v1781_v18 }
 0x368   :  { %v1501_v21 = vpop.f32.mrb[2].mxu1 }
 0x369   :  { %v413_v22 = vadd.f32 %v1501_v21, %v340_v20  ;;  %v407_v23 = vpop.f32.mrb[3].mxu1 }
 0x36a   :  { %v408_v24 = vadd.f32 %v407_v23, %v340_v20 }
 0x36b   :  { %v417_v25 = vmax.f32 %v413_v22, 0.0 }
 0x36c   :  { %v416_v26 = vmax.f32 %v408_v24, 0.0 }
 0x36e   :  { %v1749_v27 = vpack.c.bf16 %v417_v25, %v416_v26 }
 0x370   :  { %1750 = vmatprep.subr.bf16.mxu0 %v1749_v27 }
 0x371   :  { %1752 = vmatpush3.bf16.msra.mxu0 %v1749_v27 }
 0x372   :  { %1786 = vmatprep.subr.bf16.mxu0 %v1785_v62 }
 0x374   :  { %1507 = vmatmul.mubr.msk.f32.vlgmr.msra.gmra.mrb[4].mxu0 %vm79_vm0, %v419_v28 }
 0x375   :  { %1509 = vmatprep.mubr.msk.f32.mxu0 %vm79_vm0, %v420_v29  ;;  %1788 = vmatpush3.bf16.msra.mxu0 %v1785_v62 }
 0x376   :  { %1790 = vmatprep.subr.bf16.mxu0 %v1789_v0 }
 0x378   :  { %1510 = vmatmul.mubr.msk.f32.gmra.mrb[6].mxu0 %vm79_vm0, %v421_v30 }
 0x379   :  { %1512 = vmatprep.mubr.msk.f32.mxu0 %vm79_vm0, %v422_v31  ;;  %1792 = vmatpush3.bf16.msra.mxu0 %v1789_v0 }
 0x37a   :  { %1794 = vmatprep.subr.bf16.mxu0 %v1793_v3 }
 0x37c   :  { %1513 = vmatmul.mubr.msk.f32.gmra.mrb[8].mxu0 %vm79_vm0, %v423_v32 }
 0x37d   :  { %1515 = vmatprep.mubr.msk.f32.mxu0 %vm79_vm0, %v424_v33  ;;  %1796 = vmatpush3.bf16.msra.mxu0 %v1793_v3 }
 0x37e   :  { %1798 = vmatprep.subr.bf16.mxu0 %v1797_v6 }
 0x380   :  { %1516 = vmatmul.mubr.msk.f32.gmra.mrb[10].mxu0 %vm79_vm0, %v425_v34 }
 0x381   :  { %1518 = vmatprep.mubr.msk.f32.mxu0 %vm79_vm0, %v426_v35  ;;  %1800 = vmatpush3.bf16.msra.mxu0 %v1797_v6 }
 0x382   :  { %1802 = vmatprep.subr.bf16.mxu0 %v1801_v9 }
 0x384   :  { %1519 = vmatmul.mubr.msk.f32.gmra.mrb[12].mxu0 %vm79_vm0, %v427_v36 }
 0x385   :  { %1521 = vmatprep.mubr.msk.f32.mxu0 %vm79_vm0, %v428_v38  ;;  %1804 = vmatpush3.bf16.msra.mxu0 %v1801_v9 }
 0x386   :  { %1806 = vmatprep.subr.bf16.mxu0 %v1805_v12 }
 0x388   :  { %1522 = vmatmul.mubr.msk.f32.gmra.mrb[14].mxu0 %vm79_vm0, %v429_v39 }
 0x389   :  { %1524 = vmatprep.mubr.msk.f32.mxu0 %vm79_vm0, %v430_v41  ;;  %1808 = vmatpush3.bf16.msra.mxu0 %v1805_v12 }
 0x38a   :  { %1810 = vmatprep.subr.bf16.mxu0 %v1809_v15 }
 0x38c   :  { %1525 = vmatmul.mubr.msk.f32.gmra.mrb[16].mxu0 %vm79_vm0, %v431_v42 }
 0x38d   :  { %1527 = vmatprep.mubr.msk.f32.mxu0 %vm79_vm0, %v432_v43  ;;  %1812 = vmatpush3.bf16.msra.mxu0 %v1809_v15 }
 0x390   :  { %1528 = vmatmul.mubr.msk.f32.gmra.mrb[18].mxu0 %vm79_vm0, %v433_v44 }
 0x391   :  { %1530 = vmatprep.mubr.msk.f32.mxu0 %vm79_vm0, %v434_v45 }
 0x394   :  { %1531 = vmatmul.mubr.msk.f32.gmra.mrb[20].mxu0 %vm79_vm0, %v435_v46 }
 0x395   :  { %1533 = vmatprep.mubr.msk.f32.mxu0 %vm79_vm0, %v436_v47 }
 0x398   :  { %1534 = vmatmul.mubr.msk.f32.gmra.mrb[22].mxu0 %vm79_vm0, %v437_v48  ;;  %v75_v48 = vld [vmem:[%s2354_s4 + $0x70] sm:$0xff] }
 0x399   :  { %1536 = vmatprep.mubr.msk.f32.mxu0 %vm79_vm0, %v438_v49  ;;  %v76_v49 = vld [vmem:[%s2354_s4 + $0x78] sm:$0xff] }
 0x39c   :  { %1537 = vmatmul.mubr.msk.f32.gmra.mrb[24].mxu0 %vm79_vm0, %v439_v50  ;;  %v1813_v50 = vpack.c.bf16 %v76_v49, %v75_v48 }
 0x39d   :  { %1539 = vmatprep.mubr.msk.f32.mxu0 %vm79_vm0, %v440_v51  ;;  %v755_v51 = vsub.s32 3, %v1929_v37 }
 0x39e   :  { %1814 = vmatprep.subr.bf16.mxu0 %v1813_v50 }
 0x39f   :  { %1816 = vmatpush3.bf16.msra.mxu0 %v1813_v50 }
 0x3a0   :  { %1540 = vmatmul.mubr.msk.f32.gmra.mrb[26].mxu0 %vm79_vm0, %v441_v52  ;;  %v2162_v52 = vrot.slane %v1935_v40, %v755_v51 }
 0x3a1   :  { %1542 = vmatprep.mubr.msk.f32.mxu0 %vm79_vm0, %v442_v53 }
 0x3a4   :  { %1543 = vmatmul.mubr.msk.f32.gmra.mrb[28].mxu0 %vm79_vm0, %v443_v54 }
 0x3a5   :  { %1545 = vmatprep.mubr.msk.f32.mxu0 %vm79_vm0, %v444_v55 }
 0x3a8   :  { %1546 = vmatmul.mubr.msk.f32.gmra.mrb[30].mxu0 %vm79_vm0, %v445_v56 }
 0x3a9   :  { %1548 = vmatprep.mubr.msk.f32.mxu0 %vm79_vm0, %v446_v57 }
 0x3ac   :  { %1549 = vmatmul.mubr.msk.f32.gmra.mrb[32].mxu0 %vm79_vm0, %v447_v58 }
 0x447   :  { %v1508_v16 = vpop.f32.mrb[4].mxu0 }
 0x448   :  { %v604_v17 = vpop.f32.mrb[5].mxu0 }
 0x449   :  { %1583 = vmatprep.mubr.f32.mxu1 %v604_v17 }
 0x44a   :  { %1584 = vmatmul.mubr.f32.vlgmr.msra.gmra.mrb[4].mxu1 %v1508_v16 }
 0x44b   :  { %v1511_v18 = vpop.f32.mrb[6].mxu0 }
 0x44c   :  { %v614_v19 = vpop.f32.mrb[7].mxu0 }
 0x44d   :  { %1586 = vmatprep.mubr.f32.mxu1 %v614_v19 }
 0x44e   :  { %1587 = vmatmul.mubr.f32.gmra.mrb[6].mxu1 %v1511_v18 }
 0x44f   :  { %v1514_v20 = vpop.f32.mrb[8].mxu0 }
 0x450   :  { %v624_v21 = vpop.f32.mrb[9].mxu0 }
 0x451   :  { %1589 = vmatprep.mubr.f32.mxu1 %v624_v21 }
 0x452   :  { %1590 = vmatmul.mubr.f32.gmra.mrb[8].mxu1 %v1514_v20 }
 0x453   :  { %v1517_v22 = vpop.f32.mrb[10].mxu0 }
 0x454   :  { %v634_v23 = vpop.f32.mrb[11].mxu0 }
 0x455   :  { %1592 = vmatprep.mubr.f32.mxu1 %v634_v23 }
 0x456   :  { %1593 = vmatmul.mubr.f32.gmra.mrb[10].mxu1 %v1517_v22 }
 0x457   :  { %v1520_v24 = vpop.f32.mrb[12].mxu0 }
 0x458   :  { %v644_v25 = vpop.f32.mrb[13].mxu0 }
 0x459   :  { %1595 = vmatprep.mubr.f32.mxu1 %v644_v25 }
 0x45a   :  { %1596 = vmatmul.mubr.f32.gmra.mrb[12].mxu1 %v1520_v24 }
 0x45b   :  { %v1523_v26 = vpop.f32.mrb[14].mxu0 }
 0x45c   :  { %v654_v27 = vpop.f32.mrb[15].mxu0 }
 0x45d   :  { %1598 = vmatprep.mubr.f32.mxu1 %v654_v27 }
 0x45e   :  { %1599 = vmatmul.mubr.f32.gmra.mrb[14].mxu1 %v1523_v26 }
 0x45f   :  { %v1526_v28 = vpop.f32.mrb[16].mxu0 }
 0x460   :  { %v664_v29 = vpop.f32.mrb[17].mxu0 }
 0x461   :  { %1601 = vmatprep.mubr.f32.mxu1 %v664_v29 }
 0x462   :  { %1602 = vmatmul.mubr.f32.gmra.mrb[16].mxu1 %v1526_v28 }
 0x463   :  { %v1529_v30 = vpop.f32.mrb[18].mxu0 }
 0x464   :  { %v674_v31 = vpop.f32.mrb[19].mxu0 }
 0x465   :  { %1604 = vmatprep.mubr.f32.mxu1 %v674_v31 }
 0x466   :  { %1605 = vmatmul.mubr.f32.gmra.mrb[18].mxu1 %v1529_v30 }
 0x467   :  { %v1532_v32 = vpop.f32.mrb[20].mxu0 }
 0x468   :  { %v684_v33 = vpop.f32.mrb[21].mxu0 }
 0x469   :  { %1607 = vmatprep.mubr.f32.mxu1 %v684_v33 }
 0x46a   :  { %1608 = vmatmul.mubr.f32.gmra.mrb[20].mxu1 %v1532_v32 }
 0x46b   :  { %v1535_v34 = vpop.f32.mrb[22].mxu0 }
 0x46c   :  { %v694_v35 = vpop.f32.mrb[23].mxu0 }
 0x46d   :  { %1610 = vmatprep.mubr.f32.mxu1 %v694_v35 }
 0x46e   :  { %1611 = vmatmul.mubr.f32.gmra.mrb[22].mxu1 %v1535_v34 }
 0x46f   :  { %v1538_v36 = vpop.f32.mrb[24].mxu0 }
 0x470   :  { %v704_v38 = vpop.f32.mrb[25].mxu0 }
 0x471   :  { %1613 = vmatprep.mubr.f32.mxu1 %v704_v38 }
 0x472   :  { %1614 = vmatmul.mubr.f32.gmra.mrb[24].mxu1 %v1538_v36 }
 0x473   :  { %v1541_v39 = vpop.f32.mrb[26].mxu0 }
 0x474   :  { %v714_v41 = vpop.f32.mrb[27].mxu0 }
 0x475   :  { %1616 = vmatprep.mubr.f32.mxu1 %v714_v41 }
 0x476   :  { %1617 = vmatmul.mubr.f32.gmra.mrb[26].mxu1 %v1541_v39 }
 0x477   :  { %v1544_v42 = vpop.f32.mrb[28].mxu0 }
 0x478   :  { %v724_v43 = vpop.f32.mrb[29].mxu0 }
 0x479   :  { %1619 = vmatprep.mubr.f32.mxu1 %v724_v43 }
 0x47a   :  { %1620 = vmatmul.mubr.f32.gmra.mrb[28].mxu1 %v1544_v42 }
 0x47b   :  { %v1547_v44 = vpop.f32.mrb[30].mxu0 }
 0x47c   :  { %v734_v45 = vpop.f32.mrb[31].mxu0 }
 0x47d   :  { %1622 = vmatprep.mubr.f32.mxu1 %v734_v45 }
 0x47e   :  { %1623 = vmatmul.mubr.f32.gmra.mrb[30].mxu1 %v1547_v44 }
 0x47f   :  { %v1550_v46 = vpop.f32.mrb[32].mxu0 }
 0x480   :  { %v744_v47 = vpop.f32.mrb[33].mxu0 }
 0x481   :  { %1625 = vmatprep.mubr.f32.mxu1 %v744_v47 }
 0x482   :  { %1626 = vmatmul.mubr.f32.gmra.mrb[32].mxu1 %v1550_v46 }
 0x51d   :  { %v1585_v53 = vpop.f32.mrb[4].mxu1 }
 0x51e   :  { %v829_v54 = vadd.f32 %v1585_v53, %v2162_v52  ;;  %v823_v55 = vpop.f32.mrb[5].mxu1 }
 0x51f   :  { %v824_v56 = vadd.f32 %v823_v55, %v2162_v52 }
 0x520   :  { %v973_v59 = vmax.f32 %v829_v54, 0.0 }
 0x521   :  { %v972_v57 = vmax.f32 %v824_v56, 0.0  ;;  %v1588_v58 = vpop.f32.mrb[6].mxu1 }
 0x522   :  { %v839_v60 = vadd.f32 %v1588_v58, %v2162_v52  ;;  %v833_v61 = vpop.f32.mrb[7].mxu1 }
 0x523   :  { %v834_v62 = vadd.f32 %v833_v61, %v2162_v52  ;;  %1660 = vmatprep.mubr.f32.mxu0 %v972_v57 }
 0x524   :  { %1661 = vmatmul.mubr.f32.vlgmr.msra.gmra.mrb[34].mxu0 %v973_v59  ;;  %v975_v40 = vmax.f32 %v839_v60, 0.0 }
 0x525   :  { %v974_v37 = vmax.f32 %v834_v62, 0.0  ;;  %v1591_v63 = vpop.f32.mrb[8].mxu1 }
 0x526   :  { %v849_v0 = vadd.f32 %v1591_v63, %v2162_v52  ;;  %v843_v1 = vpop.f32.mrb[9].mxu1 }
 0x527   :  { %v844_v2 = vadd.f32 %v843_v1, %v2162_v52  ;;  %1663 = vmatprep.mubr.f32.mxu0 %v974_v37 }
 0x528   :  { %1664 = vmatmul.mubr.f32.gmra.mrb[36].mxu0 %v975_v40  ;;  %v977_v5 = vmax.f32 %v849_v0, 0.0 }
 0x529   :  { %v976_v3 = vmax.f32 %v844_v2, 0.0  ;;  %v1594_v4 = vpop.f32.mrb[10].mxu1 }
 0x52a   :  { %v859_v6 = vadd.f32 %v1594_v4, %v2162_v52  ;;  %v853_v7 = vpop.f32.mrb[11].mxu1 }
 0x52b   :  { %v854_v8 = vadd.f32 %v853_v7, %v2162_v52  ;;  %1666 = vmatprep.mubr.f32.mxu0 %v976_v3 }
 0x52c   :  { %1667 = vmatmul.mubr.f32.gmra.mrb[38].mxu0 %v977_v5  ;;  %v979_v11 = vmax.f32 %v859_v6, 0.0 }
 0x52d   :  { %v978_v9 = vmax.f32 %v854_v8, 0.0  ;;  %v1597_v10 = vpop.f32.mrb[12].mxu1 }
 0x52e   :  { %v869_v12 = vadd.f32 %v1597_v10, %v2162_v52  ;;  %v863_v13 = vpop.f32.mrb[13].mxu1 }
 0x52f   :  { %v864_v14 = vadd.f32 %v863_v13, %v2162_v52  ;;  %1669 = vmatprep.mubr.f32.mxu0 %v978_v9 }
 0x530   :  { %1670 = vmatmul.mubr.f32.gmra.mrb[40].mxu0 %v979_v11  ;;  %v981_v17 = vmax.f32 %v869_v12, 0.0 }
 0x531   :  { %v980_v15 = vmax.f32 %v864_v14, 0.0  ;;  %v1600_v16 = vpop.f32.mrb[14].mxu1  ;;  %v2197_v14 = vld [vmem:[%s2354_s4 + $0x80] ss:$0 sm:$0xff] }
 0x532   :  { %v879_v18 = vadd.f32 %v1600_v16, %v2162_v52  ;;  %v873_v19 = vpop.f32.mrb[15].mxu1 }
 0x533   :  { %v874_v20 = vadd.f32 %v873_v19, %v2162_v52  ;;  %1672 = vmatprep.mubr.f32.mxu0 %v980_v15 }
 0x534   :  { %1673 = vmatmul.mubr.f32.gmra.mrb[42].mxu0 %v981_v17  ;;  %v983_v23 = vmax.f32 %v879_v18, 0.0 }
 0x535   :  { %v982_v21 = vmax.f32 %v874_v20, 0.0  ;;  %v1603_v22 = vpop.f32.mrb[16].mxu1 }
 0x536   :  { %v889_v24 = vadd.f32 %v1603_v22, %v2162_v52  ;;  %v883_v25 = vpop.f32.mrb[17].mxu1 }
 0x537   :  { %v884_v26 = vadd.f32 %v883_v25, %v2162_v52  ;;  %1675 = vmatprep.mubr.f32.mxu0 %v982_v21 }
 0x538   :  { %1676 = vmatmul.mubr.f32.gmra.mrb[44].mxu0 %v983_v23  ;;  %v985_v29 = vmax.f32 %v889_v24, 0.0 }
 0x539   :  { %v984_v27 = vmax.f32 %v884_v26, 0.0  ;;  %v1606_v28 = vpop.f32.mrb[18].mxu1 }
 0x53a   :  { %v899_v30 = vadd.f32 %v1606_v28, %v2162_v52  ;;  %v893_v31 = vpop.f32.mrb[19].mxu1 }
 0x53b   :  { %v894_v32 = vadd.f32 %v893_v31, %v2162_v52  ;;  %1678 = vmatprep.mubr.f32.mxu0 %v984_v27 }
 0x53c   :  { %1679 = vmatmul.mubr.f32.gmra.mrb[46].mxu0 %v985_v29  ;;  %v987_v35 = vmax.f32 %v899_v30, 0.0 }
 0x53d   :  { %v986_v33 = vmax.f32 %v894_v32, 0.0  ;;  %v1609_v34 = vpop.f32.mrb[20].mxu1 }
 0x53e   :  { %v909_v36 = vadd.f32 %v1609_v34, %v2162_v52  ;;  %v903_v38 = vpop.f32.mrb[21].mxu1 }
 0x53f   :  { %v904_v39 = vadd.f32 %v903_v38, %v2162_v52  ;;  %1681 = vmatprep.mubr.f32.mxu0 %v986_v33 }
 0x540   :  { %1682 = vmatmul.mubr.f32.gmra.mrb[48].mxu0 %v987_v35  ;;  %v989_v43 = vmax.f32 %v909_v36, 0.0 }
 0x541   :  { %v988_v41 = vmax.f32 %v904_v39, 0.0  ;;  %v1612_v42 = vpop.f32.mrb[22].mxu1 }
 0x542   :  { %v919_v44 = vadd.f32 %v1612_v42, %v2162_v52  ;;  %v913_v45 = vpop.f32.mrb[23].mxu1 }
 0x543   :  { %v914_v46 = vadd.f32 %v913_v45, %v2162_v52  ;;  %1684 = vmatprep.mubr.f32.mxu0 %v988_v41 }
 0x544   :  { %1685 = vmatmul.mubr.f32.gmra.mrb[50].mxu0 %v989_v43  ;;  %v991_v49 = vmax.f32 %v919_v44, 0.0 }
 0x545   :  { %v990_v47 = vmax.f32 %v914_v46, 0.0  ;;  %v1615_v48 = vpop.f32.mrb[24].mxu1 }
 0x546   :  { %v929_v50 = vadd.f32 %v1615_v48, %v2162_v52  ;;  %v923_v51 = vpop.f32.mrb[25].mxu1 }
 0x547   :  { %v924_v53 = vadd.f32 %v923_v51, %v2162_v52  ;;  %1687 = vmatprep.mubr.f32.mxu0 %v990_v47 }
 0x548   :  { %1688 = vmatmul.mubr.f32.gmra.mrb[52].mxu0 %v991_v49  ;;  %v993_v56 = vmax.f32 %v929_v50, 0.0 }
 0x549   :  { %v992_v54 = vmax.f32 %v924_v53, 0.0  ;;  %v1618_v55 = vpop.f32.mrb[26].mxu1 }
 0x54a   :  { %v939_v57 = vadd.f32 %v1618_v55, %v2162_v52  ;;  %v933_v58 = vpop.f32.mrb[27].mxu1 }
 0x54b   :  { %v934_v59 = vadd.f32 %v933_v58, %v2162_v52  ;;  %1690 = vmatprep.mubr.f32.mxu0 %v992_v54 }
 0x54c   :  { %1691 = vmatmul.mubr.f32.gmra.mrb[54].mxu0 %v993_v56  ;;  %v995_v62 = vmax.f32 %v939_v57, 0.0 }
 0x54d   :  { %v994_v60 = vmax.f32 %v934_v59, 0.0  ;;  %v1621_v61 = vpop.f32.mrb[28].mxu1 }
 0x54e   :  { %v949_v37 = vadd.f32 %v1621_v61, %v2162_v52  ;;  %v943_v63 = vpop.f32.mrb[29].mxu1 }
 0x54f   :  { %v944_v40 = vadd.f32 %v943_v63, %v2162_v52  ;;  %1693 = vmatprep.mubr.f32.mxu0 %v994_v60 }
 0x550   :  { %1694 = vmatmul.mubr.f32.gmra.mrb[56].mxu0 %v995_v62  ;;  %v997_v2 = vmax.f32 %v949_v37, 0.0 }
 0x551   :  { %v996_v0 = vmax.f32 %v944_v40, 0.0  ;;  %v1624_v1 = vpop.f32.mrb[30].mxu1 }
 0x552   :  { %v959_v3 = vadd.f32 %v1624_v1, %v2162_v52  ;;  %v953_v4 = vpop.f32.mrb[31].mxu1 }
 0x553   :  { %v954_v5 = vadd.f32 %v953_v4, %v2162_v52  ;;  %1696 = vmatprep.mubr.f32.mxu0 %v996_v0 }
 0x554   :  { %1697 = vmatmul.mubr.f32.gmra.mrb[58].mxu0 %v997_v2  ;;  %v999_v8 = vmax.f32 %v959_v3, 0.0 }
 0x555   :  { %v998_v6 = vmax.f32 %v954_v5, 0.0  ;;  %v1627_v7 = vpop.f32.mrb[32].mxu1 }
 0x556   :  { %v969_v9 = vadd.f32 %v1627_v7, %v2162_v52  ;;  %v963_v10 = vpop.f32.mrb[33].mxu1 }
 0x557   :  { %v964_v11 = vadd.f32 %v963_v10, %v2162_v52  ;;  %1699 = vmatprep.mubr.f32.mxu0 %v998_v6 }
 0x558   :  { %1700 = vmatmul.mubr.f32.gmra.mrb[60].mxu0 %v999_v8  ;;  %v1001_v13 = vmax.f32 %v969_v9, 0.0 }
 0x559   :  { %v1000_v12 = vmax.f32 %v964_v11, 0.0 }
 0x55b   :  { %1702 = vmatprep.mubr.f32.mxu0 %v1000_v12 }
 0x55c   :  { %1703 = vmatmul.mubr.f32.gmra.mrb[62].mxu0 %v1001_v13 }
 0x5f7   :  { %v1662_v15 = vpop.f32.mrb[34].mxu0 }
 0x5f8   :  { %v1078_v16 = vadd.f32 %v1662_v15, %v2197_v14  ;;  %v1072_v17 = vpop.f32.mrb[35].mxu0 }
 0x5f9   :  { %v1073_v18 = vadd.f32 %v2197_v14, %v1072_v17 }
 0x5fa   :  { %1222 = vst.msk [vmem:[%s2355_s6 + $0x8] sm:$0xff] %vm79_vm0, %v1078_v16 }
 0x5fb   :  { %1221 = vst.msk [vmem:[%s2355_s6] sm:$0xff] %vm79_vm0, %v1073_v18  ;;  %v1665_v52 = vpop.f32.mrb[36].mxu0 }
 0x5fc   :  { %v1088_v19 = vadd.f32 %v1665_v52, %v2197_v14  ;;  %v1082_v20 = vpop.f32.mrb[37].mxu0 }
 0x5fd   :  { %v1083_v21 = vadd.f32 %v2197_v14, %v1082_v20 }
 0x5fe   :  { %1224 = vst.msk [vmem:[%s2355_s6 + $0x18] sm:$0xff] %vm79_vm0, %v1088_v19 }
 0x5ff   :  { %1223 = vst.msk [vmem:[%s2355_s6 + $0x10] sm:$0xff] %vm79_vm0, %v1083_v21  ;;  %v1668_v22 = vpop.f32.mrb[38].mxu0 }
 0x600   :  { %v1098_v23 = vadd.f32 %v1668_v22, %v2197_v14  ;;  %v1092_v24 = vpop.f32.mrb[39].mxu0 }
 0x601   :  { %v1093_v25 = vadd.f32 %v2197_v14, %v1092_v24 }
 0x602   :  { %1226 = vst.msk [vmem:[%s2355_s6 + $0x28] sm:$0xff] %vm79_vm0, %v1098_v23 }
 0x603   :  { %1225 = vst.msk [vmem:[%s2355_s6 + $0x20] sm:$0xff] %vm79_vm0, %v1093_v25  ;;  %v1671_v26 = vpop.f32.mrb[40].mxu0 }
 0x604   :  { %v1108_v27 = vadd.f32 %v1671_v26, %v2197_v14  ;;  %v1102_v28 = vpop.f32.mrb[41].mxu0 }
 0x605   :  { %v1103_v29 = vadd.f32 %v2197_v14, %v1102_v28 }
 0x606   :  { %1228 = vst.msk [vmem:[%s2355_s6 + $0x38] sm:$0xff] %vm79_vm0, %v1108_v27 }
 0x607   :  { %1227 = vst.msk [vmem:[%s2355_s6 + $0x30] sm:$0xff] %vm79_vm0, %v1103_v29  ;;  %v1674_v30 = vpop.f32.mrb[42].mxu0 }
 0x608   :  { %v1118_v31 = vadd.f32 %v1674_v30, %v2197_v14  ;;  %v1112_v32 = vpop.f32.mrb[43].mxu0 }
 0x609   :  { %v1113_v33 = vadd.f32 %v2197_v14, %v1112_v32 }
 0x60a   :  { %1230 = vst.msk [vmem:[%s2355_s6 + $0x48] sm:$0xff] %vm79_vm0, %v1118_v31 }
 0x60b   :  { %1229 = vst.msk [vmem:[%s2355_s6 + $0x40] sm:$0xff] %vm79_vm0, %v1113_v33  ;;  %v1677_v34 = vpop.f32.mrb[44].mxu0 }
 0x60c   :  { %v1128_v35 = vadd.f32 %v1677_v34, %v2197_v14  ;;  %v1122_v36 = vpop.f32.mrb[45].mxu0 }
 0x60d   :  { %v1123_v38 = vadd.f32 %v2197_v14, %v1122_v36 }
 0x60e   :  { %1232 = vst.msk [vmem:[%s2355_s6 + $0x58] sm:$0xff] %vm79_vm0, %v1128_v35 }
 0x60f   :  { %1231 = vst.msk [vmem:[%s2355_s6 + $0x50] sm:$0xff] %vm79_vm0, %v1123_v38  ;;  %v1680_v39 = vpop.f32.mrb[46].mxu0 }
 0x610   :  { %v1138_v41 = vadd.f32 %v1680_v39, %v2197_v14  ;;  %v1132_v42 = vpop.f32.mrb[47].mxu0 }
 0x611   :  { %v1133_v43 = vadd.f32 %v2197_v14, %v1132_v42 }
 0x612   :  { %1234 = vst.msk [vmem:[%s2355_s6 + $0x68] sm:$0xff] %vm79_vm0, %v1138_v41 }
 0x613   :  { %1233 = vst.msk [vmem:[%s2355_s6 + $0x60] sm:$0xff] %vm79_vm0, %v1133_v43  ;;  %v1683_v44 = vpop.f32.mrb[48].mxu0 }
 0x614   :  { %v1148_v45 = vadd.f32 %v1683_v44, %v2197_v14  ;;  %v1142_v46 = vpop.f32.mrb[49].mxu0 }
 0x615   :  { %v1143_v47 = vadd.f32 %v2197_v14, %v1142_v46 }
 0x616   :  { %1236 = vst.msk [vmem:[%s2355_s6 + $0x78] sm:$0xff] %vm79_vm0, %v1148_v45 }
 0x617   :  { %1235 = vst.msk [vmem:[%s2355_s6 + $0x70] sm:$0xff] %vm79_vm0, %v1143_v47  ;;  %v1686_v48 = vpop.f32.mrb[50].mxu0 }
 0x618   :  { %v1158_v49 = vadd.f32 %v1686_v48, %v2197_v14  ;;  %v1152_v50 = vpop.f32.mrb[51].mxu0 }
 0x619   :  { %v1153_v51 = vadd.f32 %v2197_v14, %v1152_v50 }
 0x61a   :  { %1238 = vst.msk [vmem:[%s2355_s6 + $0x88] sm:$0xff] %vm79_vm0, %v1158_v49 }
 0x61b   :  { %1237 = vst.msk [vmem:[%s2355_s6 + $0x80] sm:$0xff] %vm79_vm0, %v1153_v51  ;;  %v1689_v53 = vpop.f32.mrb[52].mxu0 }
 0x61c   :  { %v1168_v54 = vadd.f32 %v1689_v53, %v2197_v14  ;;  %v1162_v55 = vpop.f32.mrb[53].mxu0 }
 0x61d   :  { %v1163_v56 = vadd.f32 %v2197_v14, %v1162_v55 }
 0x61e   :  { %1240 = vst.msk [vmem:[%s2355_s6 + $0x98] sm:$0xff] %vm79_vm0, %v1168_v54 }
 0x61f   :  { %1239 = vst.msk [vmem:[%s2355_s6 + $0x90] sm:$0xff] %vm79_vm0, %v1163_v56  ;;  %v1692_v57 = vpop.f32.mrb[54].mxu0 }
 0x620   :  { %v1178_v58 = vadd.f32 %v1692_v57, %v2197_v14  ;;  %v1172_v59 = vpop.f32.mrb[55].mxu0 }
 0x621   :  { %v1173_v60 = vadd.f32 %v2197_v14, %v1172_v59 }
 0x622   :  { %1242 = vst.msk [vmem:[%s2355_s6 + $0xa8] sm:$0xff] %vm79_vm0, %v1178_v58 }
 0x623   :  { %1241 = vst.msk [vmem:[%s2355_s6 + $0xa0] sm:$0xff] %vm79_vm0, %v1173_v60  ;;  %v1695_v61 = vpop.f32.mrb[56].mxu0 }
 0x624   :  { %v1188_v62 = vadd.f32 %v1695_v61, %v2197_v14  ;;  %v1182_v37 = vpop.f32.mrb[57].mxu0 }
 0x625   :  { %v1183_v63 = vadd.f32 %v2197_v14, %v1182_v37 }
 0x626   :  { %1244 = vst.msk [vmem:[%s2355_s6 + $0xb8] sm:$0xff] %vm79_vm0, %v1188_v62 }
 0x627   :  { %1243 = vst.msk [vmem:[%s2355_s6 + $0xb0] sm:$0xff] %vm79_vm0, %v1183_v63  ;;  %v1698_v40 = vpop.f32.mrb[58].mxu0 }
 0x628   :  { %v1198_v0 = vadd.f32 %v1698_v40, %v2197_v14  ;;  %v1192_v1 = vpop.f32.mrb[59].mxu0 }
 0x629   :  { %v1193_v2 = vadd.f32 %v2197_v14, %v1192_v1 }
 0x62a   :  { %1246 = vst.msk [vmem:[%s2355_s6 + $0xc8] sm:$0xff] %vm79_vm0, %v1198_v0 }
 0x62b   :  { %1245 = vst.msk [vmem:[%s2355_s6 + $0xc0] sm:$0xff] %vm79_vm0, %v1193_v2  ;;  %v1701_v3 = vpop.f32.mrb[60].mxu0 }
 0x62c   :  { %v1208_v4 = vadd.f32 %v1701_v3, %v2197_v14  ;;  %v1202_v5 = vpop.f32.mrb[61].mxu0 }
 0x62d   :  { %v1203_v6 = vadd.f32 %v2197_v14, %v1202_v5 }
 0x62e   :  { %1248 = vst.msk [vmem:[%s2355_s6 + $0xd8] sm:$0xff] %vm79_vm0, %v1208_v4 }
 0x62f   :  { %1247 = vst.msk [vmem:[%s2355_s6 + $0xd0] sm:$0xff] %vm79_vm0, %v1203_v6  ;;  %v1704_v7 = vpop.f32.mrb[62].mxu0 }
 0x630   :  { %v1218_v8 = vadd.f32 %v1704_v7, %v2197_v14  ;;  %v1212_v9 = vpop.f32.mrb[63].mxu0 }
 0x631   :  { %v1213_v10 = vadd.f32 %v2197_v14, %v1212_v9 }
 0x632   :  { %1250 = vst.msk [vmem:[%s2355_s6 + $0xe8] sm:$0xff] %vm79_vm0, %v1218_v8 }
 0x633   :  { %1249 = vst.msk [vmem:[%s2355_s6 + $0xe0] sm:$0xff] %vm79_vm0, %v1213_v10 }

</bundles_post_ra>
